<compile_context>
chip_gen: v6e
topology: v6e:2x2x1
jax: 0.10.0
libtpu: 0.0.40
codegen_flags: <defaults>
</compile_context>

<pallas_src>
import functools
import math

import jax
import jax.numpy as jnp
from jax import lax
from jax.experimental import pallas as pl
from jax.experimental.pallas import tpu as pltpu

_LANE = 128   # lane width (last-dim tiling)
_SUB = 16     # row-tile granularity (bf16 sublane packing)


def _round_up(a: int, m: int) -> int:
    return -(-a // m) * m


# ----------------------------------------------------------------------------
# Kernels
# ----------------------------------------------------------------------------
def _nt_xent_stream_kernel(xq_ref, xk_ref, pos_ref, out_ref, acc_ref, *,
                           sub_const, two_b):
    """Streamed-key path: grid = (num_query_tiles, num_key_tiles)."""
    i = pl.program_id(0)
    k = pl.program_id(1)
    nk = pl.num_programs(1)

    @pl.when(k == 0)
    def _():
        acc_ref[...] = jnp.zeros_like(acc_ref)

    # (tk, Dp) x (tq, Dp) contracting last dims -> (tk, tq); bf16 MXU, f32 acc.
    s = lax.dot_general(xk_ref[...], xq_ref[...],
                        (((1,), (1,)), ((), ())),
                        preferred_element_type=jnp.float32)
    # Reduce over keys (sublane axis) -> lane-dense (1, tq) running sum.
    acc_ref[...] += jnp.sum(jnp.exp(s), axis=0, keepdims=True)

    @pl.when(k == nk - 1)
    def _():
        tq = out_ref.shape[-1]
        # per_row = log(row_sum - [exp(1/tau) + #padded_keys]) - pos/tau
        per_row = jnp.log(acc_ref[...] - sub_const) - pos_ref[...]
        q_idx = i * tq + lax.broadcasted_iota(jnp.int32, per_row.shape, 1)
        out_ref[...] = jnp.where(q_idx < two_b, per_row, 0.0)


def _nt_xent_resident_kernel(xq_ref, xk_ref, pos_ref, out_ref, *,
                             sub_const, two_b, tile_k):
    """Resident-key path: keys live in VMEM once; loop key slices in-kernel."""
    i = pl.program_id(0)
    tq = out_ref.shape[-1]
    nk = xk_ref.shape[0] // tile_k
    q = xq_ref[...]                                     # (tq, Dp), loaded once

    def body(k, acc):
        off = pl.multiple_of(k * tile_k, tile_k)
        kb = xk_ref[pl.ds(off, tile_k), :]              # (tk, Dp)
        s = lax.dot_general(kb, q, (((1,), (1,)), ((), ())),
                            preferred_element_type=jnp.float32)
        return acc + jnp.sum(jnp.exp(s), axis=0, keepdims=True)

    row_sum = lax.fori_loop(0, nk, body, jnp.zeros((1, tq), jnp.float32))
    per_row = jnp.log(row_sum - sub_const) - pos_ref[...]
    q_idx = i * tq + lax.broadcasted_iota(jnp.int32, per_row.shape, 1)
    out_ref[...] = jnp.where(q_idx < two_b, per_row, 0.0)


# ----------------------------------------------------------------------------
# Wrapper
# ----------------------------------------------------------------------------
def contrastive_loss(xi, xj, tau=1.0, normalize=False, *,
                     tile_q=512, tile_k=256, resident=None,
                     operand_dtype=jnp.bfloat16,
                     vmem_budget_bytes=20 * (1 << 20)):
    """Pallas TPU implementation of the PyTorch contrastive_loss.forward."""
    assert xi.ndim == 2 and xi.shape == xj.shape
    B, D = xi.shape
    two_b = 2 * B
    inv_tau = 1.0 / float(tau)

    # ---- one-time wrapper-side prep (fused by XLA under jit) ----
    x = jnp.concatenate([xi, xj], axis=0).astype(jnp.float32)      # (2B, D)
    if normalize:
        inv_n = lax.rsqrt(jnp.maximum(jnp.sum(x * x, axis=-1, keepdims=True),
                                      1e-30))
        x = x * inv_n
    pos = jnp.sum(x[:B] * x[B:], axis=-1)                          # (B,)
    pos = jnp.concatenate([pos, pos], axis=0) * inv_tau            # pre-scaled

    # ---- tile / padding selection ----
    Dp = _round_up(max(D, 1), _LANE)
    rows16 = _round_up(two_b, _SUB)
    elem = jnp.dtype(operand_dtype).itemsize

    if rows16 <= tile_q:
        tq = rows16
        half = rows16 // 2
        if half >= _LANE and half % _LANE == 0:
            tq = half                      # >= 2 query tiles for v7x megacore
        tk = min(_round_up(min(tile_k, rows16), _SUB), rows16)
    else:
        tq = max(_LANE, (min(tile_q, rows16) // _LANE) * _LANE)    # lane-dense out
        tk = max(_SUB, _round_up(min(tile_k, rows16), _SUB))
    if tq % tk and tk % tq:
        tk = math.gcd(tq, tk)

    def _stream_bytes(tq_, tk_):
        return (2 * tq_ * Dp * elem        # query tile (double buffered)
                + 2 * tk_ * Dp * elem      # key tile   (double buffered)
                + 2 * tk_ * tq_ * 4        # score/exp intermediate
                + 5 * tq_ * 4)             # pos / out / accumulator

    # Shrink tiles if needed so the streamed path fits a v7x-safe VMEM budget.
    while _stream_bytes(tq, tk) > vmem_budget_bytes and tq >= 2 * _LANE:
        tq = _round_up(tq // 2, _LANE)
    while _stream_bytes(tq, tk) > vmem_budget_bytes and tk >= 2 * _SUB:
        tk = _round_up(tk // 2, _SUB)
    if tq % tk and tk % tq:
        tk = math.gcd(tq, tk)

    rows_pad = _round_up(rows16, max(tq, tk))
    nq, nk = rows_pad // tq, rows_pad // tk

    # Resident keys: whole key matrix (double buffered) + query tile + exp
    # intermediate must fit the budget; otherwise stream key tiles.
    resident_bytes = (2 * rows_pad * Dp * elem + 2 * tq * Dp * elem
                      + 2 * tk * tq * 4 + 5 * tq * 4)
    use_resident = (resident_bytes <= vmem_budget_bytes) if resident is None \
        else bool(resident)

    # Padded key rows are exact zeros -> each contributes exp(0) = 1.
    sub_const = float(math.exp(inv_tau)) + float(rows_pad - two_b)

    xq = (x * inv_tau).astype(operand_dtype)        # 1/tau folded into queries
    xk = x.astype(operand_dtype)
    xq_p = jnp.zeros((rows_pad, Dp), operand_dtype).at[:two_b, :D].set(xq)
    xk_p = jnp.zeros((rows_pad, Dp), operand_dtype).at[:two_b, :D].set(xk)
    pos_p = jnp.zeros((1, rows_pad), jnp.float32).at[0, :two_b].set(pos)

    vmem_limit = 32 * (1 << 20)   # > v5e's 16 MiB default, <= physical on all gens

    if use_resident:
        kernel = functools.partial(_nt_xent_resident_kernel,
                                   sub_const=sub_const, two_b=two_b, tile_k=tk)
        per_row = pl.pallas_call(
            kernel,
            out_shape=jax.ShapeDtypeStruct((1, rows_pad), jnp.float32),
            grid_spec=pltpu.PrefetchScalarGridSpec(
                num_scalar_prefetch=0,
                grid=(nq,),
                in_specs=[
                    pl.BlockSpec((tq, Dp), lambda i: (i, 0)),        # queries
                    pl.BlockSpec((rows_pad, Dp), lambda i: (0, 0)),  # keys (resident)
                    pl.BlockSpec((1, tq), lambda i: (0, i)),         # pos (lane-dense)
                ],
                out_specs=pl.BlockSpec((1, tq), lambda i: (0, i)),
            ),
            compiler_params=pltpu.CompilerParams(
                dimension_semantics=("parallel",),
                vmem_limit_bytes=vmem_limit),
        )(xq_p, xk_p, pos_p)
    else:
        kernel = functools.partial(_nt_xent_stream_kernel,
                                   sub_const=sub_const, two_b=two_b)
        per_row = pl.pallas_call(
            kernel,
            out_shape=jax.ShapeDtypeStruct((1, rows_pad), jnp.float32),
            grid_spec=pltpu.PrefetchScalarGridSpec(
                num_scalar_prefetch=0,
                grid=(nq, nk),                       # reduction (key) axis last
                in_specs=[
                    pl.BlockSpec((tq, Dp), lambda i, k: (i, 0)),     # queries
                    pl.BlockSpec((tk, Dp), lambda i, k: (k, 0)),     # key stream
                    pl.BlockSpec((1, tq), lambda i, k: (0, i)),      # pos
                ],
                out_specs=pl.BlockSpec((1, tq), lambda i, k: (0, i)),
                scratch_shapes=[pltpu.VMEM((1, tq), jnp.float32)],   # row-sum acc
            ),
            compiler_params=pltpu.CompilerParams(
                dimension_semantics=("parallel", "arbitrary"),
                vmem_limit_bytes=vmem_limit),
        )(xq_p, xk_p, pos_p)

    return jnp.sum(per_row) / two_b


# ----------------------------------------------------------------------------
# Pure-JAX reference mirroring the PyTorch module exactly (for validation).
# ----------------------------------------------------------------------------
def _reference_loss(xi, xj, tau=1.0, normalize=False):
    x = jnp.concatenate([xi, xj], axis=0)
    sim_mat = x @ x.T
    if normalize:
        n = jnp.linalg.norm(x, axis=1, keepdims=True)
        sim_mat = sim_mat / jnp.maximum(n @ n.T, 1e-16)
    sim_mat = jnp.exp(sim_mat / tau)
    if normalize:
        denom = jnp.linalg.norm(xi, axis=1) * jnp.linalg.norm(xj, axis=1)
        sim_match = jnp.exp(jnp.sum(xi * xj, axis=-1) / denom / tau)
    else:
        sim_match = jnp.exp(jnp.sum(xi * xj, axis=-1) / tau)
    sim_match = jnp.concatenate([sim_match, sim_match], axis=0)
    norm_sum = jnp.exp(jnp.ones(x.shape[0]) / tau)
    return jnp.mean(-jnp.log(sim_match / (jnp.sum(sim_mat, axis=-1) - norm_sum)))


if __name__ == "__main__":
    key = jax.random.PRNGKey(0)
    k1, k2, k3, k4 = jax.random.split(key, 4)

    # Small case (single tile, resident keys by default).
    B, D = 8, 32
    xi = jax.random.normal(k1, (B, D), dtype=jnp.float32) * 0.1
    xj = jax.random.normal(k2, (B, D), dtype=jnp.float32) * 0.1

    ref = _reference_loss(xi, xj, tau=1.0, normalize=False)

    out = contrastive_loss(xi, xj, tau=1.0, normalize=False)
    jax.block_until_ready(out)
    assert jnp.allclose(out, ref, rtol=2e-2, atol=2e-2), (out, ref)   # bf16 operands

    # f32-operand opt-in path: tight agreement with the f32 reference.
    out32 = contrastive_loss(xi, xj, tau=1.0, normalize=False,
                             operand_dtype=jnp.float32)
    jax.block_until_ready(out32)
    assert jnp.allclose(out32, ref, rtol=1e-4, atol=1e-4), (out32, ref)

    # normalize=True, tau != 1, under jit.
    loss_fn = jax.jit(lambda a, b: contrastive_loss(a, b, tau=0.5, normalize=True))
    out_n = loss_fn(xi, xj)
    jax.block_until_ready(out_n)
    ref_n = _reference_loss(xi, xj, tau=0.5, normalize=True)
    assert jnp.allclose(out_n, ref_n, rtol=2e-2, atol=2e-2), (out_n, ref_n)

    # Multi-tile shapes: exercise BOTH the resident and the streamed paths.
    B2, D2 = 192, 96
    yi = jax.random.normal(k3, (B2, D2), dtype=jnp.float32) * 0.1
    yj = jax.random.normal(k4, (B2, D2), dtype=jnp.float32) * 0.1
    ref2 = _reference_loss(yi, yj, tau=1.0, normalize=True)
    out_res = contrastive_loss(yi, yj, tau=1.0, normalize=True,
                               tile_q=128, tile_k=128, resident=True)
    out_str = contrastive_loss(yi, yj, tau=1.0, normalize=True,
                               tile_q=128, tile_k=128, resident=False)
    jax.block_until_ready((out_res, out_str))
    assert jnp.allclose(out_res, ref2, rtol=2e-2, atol=2e-2), (out_res, ref2)
    assert jnp.allclose(out_str, ref2, rtol=2e-2, atol=2e-2), (out_str, ref2)

    print("KERNEL_OK")
</pallas_src>

<mosaic_0001>
module attributes {stable_mosaic.version = 11 : i64} {
  func.func @_nt_xent_resident_kernel(%arg0: i32, %arg1: memref<16x128xbf16, #tpu.memory_space<vmem>>, %arg2: memref<16x128xbf16, #tpu.memory_space<vmem>>, %arg3: memref<1x16xf32, #tpu.memory_space<vmem>>, %arg4: memref<1x16xf32, #tpu.memory_space<vmem>>) attributes {dimension_semantics = [#tpu.dimension_semantics<parallel>], iteration_bounds = array<i64: 1>, scalar_prefetch = 0 : i64, scratch_operands = 0 : i64, tpu.core_type = #tpu.core_type<tc>, window_params = [{transform_indices = @transform_0, window_bounds = array<i64: 16, 128>}, {pipeline_mode = #tpu.pipeline_mode<synchronous>, transform_indices = @transform_1, window_bounds = array<i64: 16, 128>}, {transform_indices = @transform_2, window_bounds = array<i64: 1, 16>}, {transform_indices = @transform_3, window_bounds = array<i64: 1, 16>}]} {
    %c0 = arith.constant 0 : index
    %c0_0 = arith.constant 0 : index
    %0 = vector.load %arg1[%c0, %c0_0] : memref<16x128xbf16, #tpu.memory_space<vmem>>, vector<16x128xbf16>
    %cst = arith.constant 0.000000e+00 : f32
    %1 = vector.broadcast %cst : f32 to vector<1x16xf32>
    %c0_i32 = arith.constant 0 : i32
    %c16_i32 = arith.constant 16 : i32
    %2 = arith.muli %c0_i32, %c16_i32 : i32
    %3 = tpu.assume_multiple %2, 16 : i32
    %4 = arith.index_cast %3 : i32 to index
    %c0_1 = arith.constant 0 : index
    %5 = vector.load %arg2[%4, %c0_1] : memref<16x128xbf16, #tpu.memory_space<vmem>>, vector<16x128xbf16>
    %cst_2 = arith.constant dense<0.000000e+00> : vector<16x16xf32>
    %6 = tpu.matmul %5, %0, %cst_2 {dimension_numbers = #tpu.dot_dimension_numbers<[1], [1], [0], [0], [0, 0, 1, 0], [], []>} : vector<16x128xbf16>, vector<16x128xbf16>, vector<16x16xf32> -> vector<16x16xf32>
    %7 = math.exp %6 : vector<16x16xf32>
    %cst_3 = arith.constant dense<0.000000e+00> : vector<16xf32>
    %8 = vector.multi_reduction <add>, %7, %cst_3 [0] : vector<16x16xf32> to vector<16xf32>
    %9 = vector.shape_cast %8 : vector<16xf32> to vector<1x16xf32>
    %10 = arith.addf %1, %9 : vector<1x16xf32>
    %c1_i32 = arith.constant 1 : i32
    %cst_4 = arith.constant 2.71828175 : f32
    %11 = vector.broadcast %cst_4 : f32 to vector<1x16xf32>
    %12 = arith.subf %10, %11 : vector<1x16xf32>
    %13 = math.log %12 : vector<1x16xf32>
    %c0_5 = arith.constant 0 : index
    %c0_6 = arith.constant 0 : index
    %14 = vector.load %arg3[%c0_5, %c0_6] : memref<1x16xf32, #tpu.memory_space<vmem>>, vector<1x16xf32>
    %15 = arith.subf %13, %14 : vector<1x16xf32>
    %c16_i32_7 = arith.constant 16 : i32
    %16 = arith.muli %arg0, %c16_i32_7 : i32
    %17 = tpu.iota {dimensions = array<i32: 1>} : vector<1x16xi32>
    %18 = vector.broadcast %16 : i32 to vector<1x16xi32>
    %19 = arith.addi %18, %17 : vector<1x16xi32>
    %c16_i32_8 = arith.constant 16 : i32
    %20 = vector.broadcast %c16_i32_8 : i32 to vector<1x16xi32>
    %21 = arith.cmpi slt, %19, %20 : vector<1x16xi32>
    %cst_9 = arith.constant 0.000000e+00 : f32
    %22 = vector.broadcast %cst_9 : f32 to vector<1x16xf32>
    %23 = arith.select %21, %15, %22 : vector<1x16xi1>, vector<1x16xf32>
    %c0_10 = arith.constant 0 : index
    %c0_11 = arith.constant 0 : index
    %24 = vector.load %arg4[%c0_10, %c0_11] : memref<1x16xf32, #tpu.memory_space<vmem>>, vector<1x16xf32>
    tpu.vector_store %arg4[%c0_10, %c0_11], %23 {strides = array<i32>} : memref<1x16xf32, #tpu.memory_space<vmem>>, vector<1x16xf32>,
    return
  }
  func.func @transform_0(%arg0: i32) -> (i32, i32) {
    %c0_i32 = arith.constant 0 : i32
    %c0_i32_0 = arith.constant 0 : i32
    return %arg0, %c0_i32 : i32, i32
  }
  func.func @transform_1(%arg0: i32) -> (i32, i32) {
    %c0_i32 = arith.constant 0 : i32
    %c0_i32_0 = arith.constant 0 : i32
    %c0_i32_1 = arith.constant 0 : i32
    return %c0_i32, %c0_i32_0 : i32, i32
  }
  func.func @transform_2(%arg0: i32) -> (i32, i32) {
    %c0_i32 = arith.constant 0 : i32
    %c0_i32_0 = arith.constant 0 : i32
    return %c0_i32, %arg0 : i32, i32
  }
  func.func @transform_3(%arg0: i32) -> (i32, i32) {
    %c0_i32 = arith.constant 0 : i32
    %c0_i32_0 = arith.constant 0 : i32
    return %c0_i32, %arg0 : i32, i32
  }
}

</mosaic_0001>

<bundles_post_ra>
// kernel: tpu_custom_call.1
= control target key start
LH: loop header
LB: loop body
LE: loop exit
PB: predicated region body
PF: predicated region fallthrough
CT: control target
= control target key end

     0   :  { %8 = vsyncpa [#allocation3], 0  ;;  %s277_s0 = inlined_call_operand.hbm [shape: bf16[16,128], index: 0, kind: input, shape index: {}]   ;;  %s278_s1 = inlined_call_operand.hbm [shape: bf16[16,128], index: 1, kind: input, shape index: {}]   ;;  %s279_s2 = inlined_call_operand.vmem [shape: f32[1,16], index: 2, kind: input, shape index: {}]   ;;  %s280_s3 = inlined_call_operand.hbm [shape: f32[1,16], index: 3, kind: output, shape index: {}]  }
   0x1   :  { %9 = vsyncpa [#allocation6], 0 }
   0x2   :  { %10 = vsyncpa [#allocation4], 0  ;;  %s238_s12 = smov [#allocation2]  }
   0x3   :  { %s16_s13 = sshll.u32 %s238_s12, 4  ;;  %s17_s13 = int_to_ptr.vmem [resolvable:$true] %s16_s13 }
   0x4   :  { %s180_s14 = scalar_lea.vmem %s17_s13, 128  ;;  %p185_p1 = scmp.lt.s32.totalorder %s17_s13, %s17_s13 }
   0x5   :  { %p181_p0 = scmp.ne.s32.totalorder %s17_s13, %s180_s14  ;;  %p186_p2 = scmp.lt.s32.totalorder %s180_s14, %s180_s14 }
   0x7   :  { %p187_p3 = por %p186_p2, %p185_p1 }
   0x9   :  { %p188_p4 = pnand %p187_p3, %p181_p0 }
   0xb   :  { %191 = shalt.err (!%p188_p4)
}
   0xc   :  { %s239_s15 = smov 64   ;;  %s240_s16 = smov 4  }
   0xd   :  { %22 = dma.hbm_to_vmem [thread:$0]  %s277_s0, 128, %s17_s13, [#allocation3], %s239_s15, %s239_s15, %s240_s16  }
   0xe   :  { %s241_s19 = smov [#allocation5]  }
   0xf   :  { %s28_s20 = sshll.u32 %s241_s19, 4  ;;  %s29_s20 = int_to_ptr.vmem [resolvable:$true] %s28_s20 }
  0x10   :  { %s200_s21 = scalar_lea.vmem %s29_s20, 128  ;;  %p205_p6 = scmp.lt.s32.totalorder %s29_s20, %s29_s20 }
  0x11   :  { %p201_p5 = scmp.ne.s32.totalorder %s29_s20, %s200_s21  ;;  %p206_p7 = scmp.lt.s32.totalorder %s200_s21, %s200_s21 }
  0x13   :  { %p207_p8 = por %p206_p7, %p205_p6 }
  0x15   :  { %p208_p9 = pnand %p207_p8, %p201_p5 }
  0x17   :  { %211 = shalt.err (!%p208_p9)
}
  0x18   :  { %34 = dma.hbm_to_vmem [thread:$0]  %s278_s1, 128, %s29_s20, [#allocation6], %s239_s15, %s239_s15, %s240_s16  }
  0x19   :  { %232 = dma.done.wait [#allocation3], 128  }
  0x1a   :  { %233 = vsyncadd [#allocation3], 4294967168 }
  0x1b   :  { %234 = dma.done.wait [#allocation6], 128  }
  0x1c   :  { %235 = vsyncadd [#allocation6], 4294967168  ;;  %v242_v0 = vmov 0.0   ;;  %vm243_vm0 = vmmov 0   ;;  %v164_v1 = vld [vmem:[#allocation2] sm:$0xff]   ;;  %v165_v2 = vld [vmem:[#allocation5] sm:$0xff]   ;;  %v122_v21 = vlaneseq }
  0x1d   :  { %151 = vmatprep.subr.bf16.mxu0 %v242_v0  ;;  %153 = vmatprep.mubr.msk.bf16.mxu0 %vm243_vm0, %v242_v0  ;;  %vm105_vm1 = vcmask 130048   ;;  %v119_v24 = vld [vmem:[%s279_s2] sm:$0x1]  ;;  %s244_s24 = smov [#allocation7]   ;;  %vm128_vm3 = vcmask 122880  }
  0x1e   :  { %152 = vmatpush3.bf16.xpose.msra.mxu0 %v164_v1  ;;  %v123_v22 = vand.u32 127, %v122_v21  ;;  %s136_s25 = sshll.u32 %s244_s24, 4  ;;  %s137_s25 = int_to_ptr.vmem [resolvable:$true] %s136_s25 }
  0x1f   :  { %s212_s26 = scalar_lea.vmem %s137_s25, 16  ;;  %s216_s27 = scalar_lea.vmem %s137_s25, 32 }
  0x20   :  { %vm126_vm2 = vcmp.lt.s32.totalorder %v123_v22, 16  ;;  %p213_p10 = scmp.ne.s32.totalorder %s137_s25, %s212_s26  ;;  %p217_p11 = scmp.lt.s32.totalorder %s137_s25, %s137_s25 }
  0x21   :  { %p218_p12 = scmp.lt.s32.totalorder %s216_s27, %s212_s26 }
  0x23   :  { %p219_p13 = por %p218_p12, %p217_p11 }
  0x25   :  { %154 = vmatmul.mubr.bf16.vlgmr.msra.gmra.mxu0 %v165_v2  ;;  %p220_p0 = pnand %p219_p13, %p213_p10 }
  0xe5   :  { %v94_v3 = vpop.f32.mrf.mxu0 }
  0xe6   :  { %v101_v4 = vmul.f32 1.442695, %v94_v3 }
  0xe7   :  { %v155_v5 = vpop.f32.mrf.mxu0 }
  0xe8   :  { %166 = vpow2.f32 %v101_v4 }
  0xe9   :  { %v97_v6 = vpop.f32.mrf.mxu0 }
  0xea   :  { %v103_v7 = vmul.f32 1.442695, %v97_v6 }
  0xeb   :  { %v156_v8 = vpop.f32.mrf.mxu0 }
  0xec   :  { %168 = vpow2.f32 %v103_v7 }
  0xf5   :  { %v167_v9 = vpop.eup %166 }
  0xf6   :  { %v106_v11 = vsel %vm105_vm1, %v167_v9, 0.0 }
  0xf9   :  { %v169_v10 = vpop.eup %168 }
  0xfa   :  { %v107_v12 = vsel %vm105_vm1, %v169_v10, 0.0 }
  0xfb   :  { %v108_v13 = vadd.f32 %v107_v12, %v106_v11 }
  0xfd   :  { %v109_v14 = vrot.slane %v108_v13, 4 }
  0xff   :  { %v110_v15 = vadd.f32 %v109_v14, %v108_v13 }
 0x101   :  { %v111_v16 = vrot.slane %v110_v15, 2 }
 0x103   :  { %v112_v17 = vadd.f32 %v111_v16, %v110_v15 }
 0x105   :  { %v113_v18 = vrot.slane %v112_v17, 1 }
 0x107   :  { %v114_v19 = vadd.f32 %v113_v18, %v112_v17 }
 0x109   :  { %v148_v20 = vadd.f32 -2.7182817, %v114_v19 }
 0x10b   :  { %170 = vlog2.f32 %v148_v20 }
 0x118   :  { %v171_v23 = vpop.eup %170 }
 0x119   :  { %v118_v25 = vmul.f32 0.6931472, %v171_v23 }
 0x11b   :  { %v120_v26 = vsub.f32 %v118_v25, %v119_v24 }
 0x11d   :  { %v127_v27 = vsel %vm126_vm2, %v120_v26, 0.0 }
 0x11e   :  { %129 = vst.msk [vmem:[#allocation7] sm:$0x1] %vm128_vm3, %v127_v27 }
 0x11f   :  { %223 = shalt.err (!%p220_p0)
}
 0x120   :  { %139 = dma.vmem_to_hbm [thread:$0]  %s137_s25, 16, %s280_s3, [#allocation4]  }
 0x121   :  { %236 = dma.done.wait [#allocation4], 16  }
 0x122   :  { %237 = vsyncadd [#allocation4], 4294967280 }
 0x123   :  { %143 = vsyncpa [#allocation3], 1 }
 0x124   :  { %144 = vsyncpa [#allocation6], 1 }
 0x125   :  { %145 = vsyncpa [#allocation4], 1 }

</bundles_post_ra>
